<compile_context>
chip_gen: v6e
topology: v6e:2x2x1
jax: 0.10.0
libtpu: 0.0.40
codegen_flags: <defaults>
</compile_context>

<pallas_src>
import functools

import jax
import jax.numpy as jnp
from jax.experimental import pallas as pl
from jax.experimental.pallas import tpu as pltpu

EPS = 1e-5


def _make_taps(x, S, L):
    """x: (C_in, L) one sample, lane-flattened T*H*W.

    Builds the three temporal taps (k=0: x[t-1], k=1: x[t], k=2: x[t+1]) with zero temporal
    padding via in-VMEM lane shifts, stacked along sublanes -> (3*C_in, L).
    """
    zeros = jnp.zeros((x.shape[0], S), x.dtype)
    prev = jnp.concatenate([zeros, x[:, :L - S]], axis=1)   # x shifted: frame t-1
    nxt = jnp.concatenate([x[:, S:], zeros], axis=1)        # x shifted: frame t+1
    return jnp.concatenate([prev, x, nxt], axis=0)


def _conv_stats_kernel(x_ref, w_ref, stats_ref, *, S, L):
    # x_ref:     (1, C_in, L)     one sample, unpadded, lane-flattened
    # w_ref:     (C_out, 3*C_in)  fused temporal weights (row order k*C_in + c)
    # stats_ref: (1, 2, C_out)    per-sample [sum; sumsq] (f32)
    x = x_ref[0]
    taps = _make_taps(x, S, L)                                              # (3*C_in, L)
    y = jnp.dot(w_ref[...], taps, preferred_element_type=jnp.float32)       # (C_out, L) f32
    stats_ref[0, 0] = jnp.sum(y, axis=1)
    stats_ref[0, 1] = jnp.sum(y * y, axis=1)


def _conv_bn_relu_kernel(x_ref, w_ref, scale_ref, shift_ref, o_ref, *, S, L):
    # x_ref: (1, C_in, L); w_ref: (C_out, 3*C_in); scale/shift: (C_out, 1); o_ref: (1, C_out, L)
    x = x_ref[0]
    taps = _make_taps(x, S, L)
    y = jnp.dot(w_ref[...], taps, preferred_element_type=jnp.float32)
    o_ref[0] = jnp.maximum(y * scale_ref[...] + shift_ref[...], 0.0).astype(o_ref.dtype)


def temporal_transformer(x, w_conv, b_conv, gamma, beta, *, eps=EPS, out_dtype=None):
    """x: (N, C_in, T, H, W); w_conv: (C_out, C_in, 3); b_conv/gamma/beta: (C_out,).

    Returns (N, C_out, T, H, W) = ReLU(BatchNorm3d_train(Conv3d_{(3,1,1),pad(1,0,0)}(x))).
    b_conv is accepted for API fidelity but is mathematically a no-op under train-mode BN
    (a per-channel constant is cancelled exactly by the batch-mean subtraction).
    """
    del b_conv  # cancelled exactly by BN's batch-mean subtraction
    N, C_in, T, H, W = x.shape
    C_out = w_conv.shape[0]
    S = H * W
    L = T * S
    if out_dtype is None:
        out_dtype = x.dtype

    # free reshape: no pad, no transpose, no dtype copy of the big activation
    x_flat = x.reshape(N, C_in, L)

    # fused weight: stacked-tap row index is k*C_in + c  ->  w_fused[o, k*C_in + c] = w[o, c, k]
    w_fused = jnp.transpose(w_conv, (0, 2, 1)).reshape(C_out, 3 * C_in).astype(x.dtype)

    cparams = pltpu.CompilerParams(dimension_semantics=("parallel",))

    # ---- phase 1: conv + per-channel partial statistics, streamed over N ----
    stats = pl.pallas_call(
        functools.partial(_conv_stats_kernel, S=S, L=L),
        out_shape=jax.ShapeDtypeStruct((N, 2, C_out), jnp.float32),
        grid=(N,),
        in_specs=[pl.BlockSpec((1, C_in, L), lambda n: (n, 0, 0)),
                  pl.BlockSpec((C_out, 3 * C_in), lambda n: (0, 0))],
        out_specs=pl.BlockSpec((1, 2, C_out), lambda n: (n, 0, 0)),
        compiler_params=cparams,
    )(x_flat, w_fused)

    # ---- per-channel BN coefficients (tiny), folded scale/shift ----
    m_total = jnp.float32(N * L)
    sums = jnp.sum(stats, axis=0)                                    # (2, C_out)
    mean = sums[0] / m_total
    var = jnp.maximum(sums[1] / m_total - mean * mean, 0.0)
    inv = jax.lax.rsqrt(var + eps)
    scale = (gamma.astype(jnp.float32) * inv).reshape(C_out, 1)
    shift = (beta.astype(jnp.float32) - mean * scale[:, 0]).reshape(C_out, 1)

    # ---- phase 2: recompute conv, fused scale/shift + ReLU, direct NCDHW-order output ----
    out_flat = pl.pallas_call(
        functools.partial(_conv_bn_relu_kernel, S=S, L=L),
        out_shape=jax.ShapeDtypeStruct((N, C_out, L), out_dtype),
        grid=(N,),
        in_specs=[pl.BlockSpec((1, C_in, L), lambda n: (n, 0, 0)),
                  pl.BlockSpec((C_out, 3 * C_in), lambda n: (0, 0)),
                  pl.BlockSpec((C_out, 1), lambda n: (0, 0)),
                  pl.BlockSpec((C_out, 1), lambda n: (0, 0))],
        out_specs=pl.BlockSpec((1, C_out, L), lambda n: (n, 0, 0)),
        compiler_params=cparams,
    )(x_flat, w_fused, scale, shift)

    return out_flat.reshape(N, C_out, T, H, W)


def _reference(x, w_conv, b_conv, gamma, beta):
    """Pure-JAX reference mirroring the PyTorch forward (Conv3d + BN(train) + ReLU)."""
    N, C_in, T, H, W = x.shape
    C_out = w_conv.shape[0]
    xp = jnp.pad(x, ((0, 0), (0, 0), (1, 1), (0, 0), (0, 0)))
    y = jnp.zeros((N, C_out, T, H, W), jnp.float32)
    for k in range(3):
        y = y + jnp.einsum('oi,nithw->nothw', w_conv[:, :, k], xp[:, :, k:k + T])
    y = y + b_conv[None, :, None, None, None]
    mean = y.mean(axis=(0, 2, 3, 4), keepdims=True)
    var = ((y - mean) ** 2).mean(axis=(0, 2, 3, 4), keepdims=True)
    y = (y - mean) / jnp.sqrt(var + EPS)
    y = y * gamma[None, :, None, None, None] + beta[None, :, None, None, None]
    return jnp.maximum(y, 0.0)


if __name__ == "__main__":
    # small shapes consistent with the module: Conv3d(in_channels=4, out_channels=8)
    N, C_in, C_out, T, H, W = 2, 4, 8, 8, 4, 4

    key = jax.random.PRNGKey(0)
    k_x, k_w, k_b, k_g, k_be = jax.random.split(key, 5)

    x = jax.random.normal(k_x, (N, C_in, T, H, W), jnp.float32)
    w_conv = jax.random.normal(k_w, (C_out, C_in, 3), jnp.float32) * 0.2   # Conv3d weight ((3,1,1) squeezed)
    b_conv = jax.random.normal(k_b, (C_out,), jnp.float32) * 0.1           # Conv3d bias
    gamma = 1.0 + 0.1 * jax.random.normal(k_g, (C_out,), jnp.float32)      # BN weight
    beta = 0.1 * jax.random.normal(k_be, (C_out,), jnp.float32)            # BN bias

    ref = _reference(x, w_conv, b_conv, gamma, beta)

    # f32 path
    fwd = jax.jit(temporal_transformer)
    out = jax.block_until_ready(fwd(x, w_conv, b_conv, gamma, beta))
    assert out.shape == (N, C_out, T, H, W)
    assert out.dtype == jnp.float32
    assert jnp.allclose(out, ref, atol=2e-4, rtol=2e-4), "f32 mismatch vs reference"

    # bf16-activation path (halved HBM streaming of x; f32 MXU accumulation + f32 BN math)
    fwd_bf16 = jax.jit(temporal_transformer)
    out_bf16 = jax.block_until_ready(
        fwd_bf16(x.astype(jnp.bfloat16), w_conv, b_conv, gamma, beta))
    assert out_bf16.dtype == jnp.bfloat16
    assert jnp.allclose(out_bf16.astype(jnp.float32), ref, atol=1e-1, rtol=1e-1), \
        "bf16 mismatch vs reference"

    print("KERNEL_OK")
</pallas_src>

<mosaic_0001>
module attributes {stable_mosaic.version = 11 : i64} {
  func.func @_conv_stats_kernel(%arg0: i32, %arg1: memref<1x4x128xf32, #tpu.memory_space<vmem>>, %arg2: memref<8x12xf32, #tpu.memory_space<vmem>>, %arg3: memref<1x2x8xf32, #tpu.memory_space<vmem>>) attributes {dimension_semantics = [#tpu.dimension_semantics<parallel>], iteration_bounds = array<i64: 2>, scalar_prefetch = 0 : i64, scratch_operands = 0 : i64, tpu.core_type = #tpu.core_type<tc>, window_params = [{transform_indices = @transform_0, window_bounds = array<i64: 1, 4, 128>}, {pipeline_mode = #tpu.pipeline_mode<synchronous>, transform_indices = @transform_1, window_bounds = array<i64: 8, 12>}, {transform_indices = @transform_2, window_bounds = array<i64: 1, 2, 8>}]} {
    %c0 = arith.constant 0 : index
    %c0_0 = arith.constant 0 : index
    %c0_1 = arith.constant 0 : index
    %0 = vector.load %arg1[%c0, %c0_0, %c0_1] : memref<1x4x128xf32, #tpu.memory_space<vmem>>, vector<1x4x128xf32>
    %1 = vector.shape_cast %0 : vector<1x4x128xf32> to vector<4x128xf32>
    %cst = arith.constant 0.000000e+00 : f32
    %2 = vector.broadcast %cst : f32 to vector<4x16xf32>
    %3 = vector.extract_strided_slice %1 {offsets = [0, 0], sizes = [4, 112], strides = [1, 1]} : vector<4x128xf32> to vector<4x112xf32>
    %4 = tpu.concatenate %2, %3 in 1 : vector<4x16xf32>, vector<4x112xf32> -> vector<4x128xf32>
    %5 = vector.extract_strided_slice %1 {offsets = [0, 16], sizes = [4, 112], strides = [1, 1]} : vector<4x128xf32> to vector<4x112xf32>
    %6 = tpu.concatenate %5, %2 in 1 : vector<4x112xf32>, vector<4x16xf32> -> vector<4x128xf32>
    %7 = tpu.concatenate %4, %1, %6 in 0 : vector<4x128xf32>, vector<4x128xf32>, vector<4x128xf32> -> vector<12x128xf32>
    %c0_2 = arith.constant 0 : index
    %c0_3 = arith.constant 0 : index
    %8 = vector.load %arg2[%c0_2, %c0_3] : memref<8x12xf32, #tpu.memory_space<vmem>>, vector<8x12xf32>
    %cst_4 = arith.constant dense<0.000000e+00> : vector<8x128xf32>
    %9 = tpu.matmul %8, %7, %cst_4 {dimension_numbers = #tpu.dot_dimension_numbers<[1], [0], [0], [1], [0, 0, 1, 1], [], []>} : vector<8x12xf32>, vector<12x128xf32>, vector<8x128xf32> -> vector<8x128xf32>
    %cst_5 = arith.constant dense<0.000000e+00> : vector<8xf32>
    %10 = vector.multi_reduction <add>, %9, %cst_5 [1] : vector<8x128xf32> to vector<8xf32>
    %c0_6 = arith.constant 0 : index
    %c0_7 = arith.constant 0 : index
    %c0_8 = arith.constant 0 : index
    %11 = vector.load %arg3[%c0_6, %c0_7, %c0_8] : memref<1x2x8xf32, #tpu.memory_space<vmem>>, vector<1x1x8xf32>
    %12 = vector.shape_cast %11 : vector<1x1x8xf32> to vector<8xf32>
    %13 = vector.shape_cast %10 : vector<8xf32> to vector<1x1x8xf32>
    tpu.vector_store %arg3[%c0_6, %c0_7, %c0_8], %13 {strides = array<i32>} : memref<1x2x8xf32, #tpu.memory_space<vmem>>, vector<1x1x8xf32>,
    %14 = arith.mulf %9, %9 : vector<8x128xf32>
    %cst_9 = arith.constant dense<0.000000e+00> : vector<8xf32>
    %15 = vector.multi_reduction <add>, %14, %cst_9 [1] : vector<8x128xf32> to vector<8xf32>
    %c0_10 = arith.constant 0 : index
    %c1 = arith.constant 1 : index
    %c0_11 = arith.constant 0 : index
    %16 = vector.load %arg3[%c0_10, %c1, %c0_11] : memref<1x2x8xf32, #tpu.memory_space<vmem>>, vector<1x1x8xf32>
    %17 = vector.shape_cast %16 : vector<1x1x8xf32> to vector<8xf32>
    %18 = vector.shape_cast %15 : vector<8xf32> to vector<1x1x8xf32>
    tpu.vector_store %arg3[%c0_10, %c1, %c0_11], %18 {strides = array<i32>} : memref<1x2x8xf32, #tpu.memory_space<vmem>>, vector<1x1x8xf32>,
    return
  }
  func.func @transform_0(%arg0: i32) -> (i32, i32, i32) {
    %c0_i32 = arith.constant 0 : i32
    %c0_i32_0 = arith.constant 0 : i32
    %c0_i32_1 = arith.constant 0 : i32
    return %arg0, %c0_i32, %c0_i32_0 : i32, i32, i32
  }
  func.func @transform_1(%arg0: i32) -> (i32, i32) {
    %c0_i32 = arith.constant 0 : i32
    %c0_i32_0 = arith.constant 0 : i32
    %c0_i32_1 = arith.constant 0 : i32
    return %c0_i32, %c0_i32_0 : i32, i32
  }
  func.func @transform_2(%arg0: i32) -> (i32, i32, i32) {
    %c0_i32 = arith.constant 0 : i32
    %c0_i32_0 = arith.constant 0 : i32
    %c0_i32_1 = arith.constant 0 : i32
    return %arg0, %c0_i32, %c0_i32_0 : i32, i32, i32
  }
}

module attributes {stable_mosaic.version = 11 : i64} {
  func.func @_conv_bn_relu_kernel(%arg0: i32, %arg1: memref<1x4x128xf32, #tpu.memory_space<vmem>>, %arg2: memref<8x12xf32, #tpu.memory_space<vmem>>, %arg3: memref<8x1xf32, #tpu.memory_space<vmem>>, %arg4: memref<8x1xf32, #tpu.memory_space<vmem>>, %arg5: memref<1x8x128xf32, #tpu.memory_space<vmem>>) attributes {dimension_semantics = [#tpu.dimension_semantics<parallel>], iteration_bounds = array<i64: 2>, scalar_prefetch = 0 : i64, scratch_operands = 0 : i64, tpu.core_type = #tpu.core_type<tc>, window_params = [{transform_indices = @transform_0, window_bounds = array<i64: 1, 4, 128>}, {pipeline_mode = #tpu.pipeline_mode<synchronous>, transform_indices = @transform_1, window_bounds = array<i64: 8, 12>}, {pipeline_mode = #tpu.pipeline_mode<synchronous>, transform_indices = @transform_2, window_bounds = array<i64: 8, 1>}, {pipeline_mode = #tpu.pipeline_mode<synchronous>, transform_indices = @transform_3, window_bounds = array<i64: 8, 1>}, {transform_indices = @transform_4, window_bounds = array<i64: 1, 8, 128>}]} {
    %c0 = arith.constant 0 : index
    %c0_0 = arith.constant 0 : index
    %c0_1 = arith.constant 0 : index
    %0 = vector.load %arg1[%c0, %c0_0, %c0_1] : memref<1x4x128xf32, #tpu.memory_space<vmem>>, vector<1x4x128xf32>
    %1 = vector.shape_cast %0 : vector<1x4x128xf32> to vector<4x128xf32>
    %cst = arith.constant 0.000000e+00 : f32
    %2 = vector.broadcast %cst : f32 to vector<4x16xf32>
    %3 = vector.extract_strided_slice %1 {offsets = [0, 0], sizes = [4, 112], strides = [1, 1]} : vector<4x128xf32> to vector<4x112xf32>
    %4 = tpu.concatenate %2, %3 in 1 : vector<4x16xf32>, vector<4x112xf32> -> vector<4x128xf32>
    %5 = vector.extract_strided_slice %1 {offsets = [0, 16], sizes = [4, 112], strides = [1, 1]} : vector<4x128xf32> to vector<4x112xf32>
    %6 = tpu.concatenate %5, %2 in 1 : vector<4x112xf32>, vector<4x16xf32> -> vector<4x128xf32>
    %7 = tpu.concatenate %4, %1, %6 in 0 : vector<4x128xf32>, vector<4x128xf32>, vector<4x128xf32> -> vector<12x128xf32>
    %c0_2 = arith.constant 0 : index
    %c0_3 = arith.constant 0 : index
    %8 = vector.load %arg2[%c0_2, %c0_3] : memref<8x12xf32, #tpu.memory_space<vmem>>, vector<8x12xf32>
    %cst_4 = arith.constant dense<0.000000e+00> : vector<8x128xf32>
    %9 = tpu.matmul %8, %7, %cst_4 {dimension_numbers = #tpu.dot_dimension_numbers<[1], [0], [0], [1], [0, 0, 1, 1], [], []>} : vector<8x12xf32>, vector<12x128xf32>, vector<8x128xf32> -> vector<8x128xf32>
    %c0_5 = arith.constant 0 : index
    %c0_6 = arith.constant 0 : index
    %10 = vector.load %arg3[%c0_5, %c0_6] : memref<8x1xf32, #tpu.memory_space<vmem>>, vector<8x1xf32>
    %11 = vector.broadcast %10 : vector<8x1xf32> to vector<8x128xf32>
    %12 = arith.mulf %9, %11 : vector<8x128xf32>
    %c0_7 = arith.constant 0 : index
    %c0_8 = arith.constant 0 : index
    %13 = vector.load %arg4[%c0_7, %c0_8] : memref<8x1xf32, #tpu.memory_space<vmem>>, vector<8x1xf32>
    %14 = vector.broadcast %13 : vector<8x1xf32> to vector<8x128xf32>
    %15 = arith.addf %12, %14 : vector<8x128xf32>
    %cst_9 = arith.constant 0.000000e+00 : f32
    %16 = vector.broadcast %cst_9 : f32 to vector<8x128xf32>
    %17 = arith.maximumf %15, %16 : vector<8x128xf32>
    %c0_10 = arith.constant 0 : index
    %c0_11 = arith.constant 0 : index
    %c0_12 = arith.constant 0 : index
    %18 = vector.load %arg5[%c0_10, %c0_11, %c0_12] : memref<1x8x128xf32, #tpu.memory_space<vmem>>, vector<1x8x128xf32>
    %19 = vector.shape_cast %18 : vector<1x8x128xf32> to vector<8x128xf32>
    %20 = vector.shape_cast %17 : vector<8x128xf32> to vector<1x8x128xf32>
    tpu.vector_store %arg5[%c0_10, %c0_11, %c0_12], %20 {strides = array<i32>} : memref<1x8x128xf32, #tpu.memory_space<vmem>>, vector<1x8x128xf32>,
    return
  }
  func.func @transform_0(%arg0: i32) -> (i32, i32, i32) {
    %c0_i32 = arith.constant 0 : i32
    %c0_i32_0 = arith.constant 0 : i32
    %c0_i32_1 = arith.constant 0 : i32
    return %arg0, %c0_i32, %c0_i32_0 : i32, i32, i32
  }
  func.func @transform_1(%arg0: i32) -> (i32, i32) {
    %c0_i32 = arith.constant 0 : i32
    %c0_i32_0 = arith.constant 0 : i32
    %c0_i32_1 = arith.constant 0 : i32
    return %c0_i32, %c0_i32_0 : i32, i32
  }
  func.func @transform_2(%arg0: i32) -> (i32, i32) {
    %c0_i32 = arith.constant 0 : i32
    %c0_i32_0 = arith.constant 0 : i32
    %c0_i32_1 = arith.constant 0 : i32
    return %c0_i32, %c0_i32_0 : i32, i32
  }
  func.func @transform_3(%arg0: i32) -> (i32, i32) {
    %c0_i32 = arith.constant 0 : i32
    %c0_i32_0 = arith.constant 0 : i32
    %c0_i32_1 = arith.constant 0 : i32
    return %c0_i32, %c0_i32_0 : i32, i32
  }
  func.func @transform_4(%arg0: i32) -> (i32, i32, i32) {
    %c0_i32 = arith.constant 0 : i32
    %c0_i32_0 = arith.constant 0 : i32
    %c0_i32_1 = arith.constant 0 : i32
    return %arg0, %c0_i32, %c0_i32_0 : i32, i32, i32
  }
}

</mosaic_0001>

<bundles_post_ra>
// kernel: temporal_transformer.3
= control target key start
LH: loop header
LB: loop body
LE: loop exit
PB: predicated region body
PF: predicated region fallthrough
CT: control target
= control target key end

     0   :  { %s430_s15 = smov 0   ;;  %s460_s0 = inlined_call_operand.vmem [shape: f32[2,4,128], index: 0, kind: input, shape index: {}]   ;;  %s461_s1 = inlined_call_operand.vmem [shape: f32[8,12], index: 1, kind: input, shape index: {}]   ;;  %s462_s2 = inlined_call_operand.vmem [shape: f32[8,1], index: 2, kind: input, shape index: {}]   ;;  %s463_s3 = inlined_call_operand.vmem [shape: f32[8,1], index: 3, kind: input, shape index: {}]   ;;  %s464_s4 = inlined_call_operand.vmem [shape: f32[2,8,128], index: 4, kind: output, shape index: {}]  }
   0x1 LB: > { %s356_s16 = sadd.s32 4294967295, %s398_s15   ;;  %p360_p0 = scmp.ge.s32.totalorder %s398_s15, 1  ;;  %s398_s15 = sphi %s430_s15, %s14_s15  }
   0x2   : > { %p161_p1 = scmp.lt.s32.totalorder %s398_s15, 3 }
   0x4   : > { %p162_p2 = pnand %p360_p0, %p161_p1 }
   0x5   : > { %p185_p3 = scmp.lt.s32.totalorder (!%p162_p2), %s356_s16, 1  ;;  %s403_s25 = smov (!%p162_p2), 112  }
   0x6   : > { %165 = sbr.rel (%p162_p2) target bundleno = 337 (0x151), region = 36  ;;  %s404_s26 = smov (!%p162_p2), 16  }
   0xb   : > { %v400_v0 = vmov 0.0   ;;  %v287_v1 = vld [vmem:[%s462_s2] sm:$0xff]  ;;  %s466_s16 = smov (!%p185_p3, %s356_s16), 1  ;;  %vm401_vm0 = vmmov 0   ;;  %v402_v2 = vmov 0   ;;  %vm203_vm1 = vcmask 916480  }
   0xc   : > { %370 = vmatprep.subr.mxu0 %v400_v0  ;;  %374 = vmatprep.mubr.msk.f32.mxu0 %vm401_vm0, %v400_v0  ;;  %s361_s19 = sshll.u32 %s466_s16, 2  ;;  %v294_v3 = vld [vmem:[%s463_s3] sm:$0xff]  ;;  %vm207_vm2 = vcmask 1043456   ;;  %vm198_vm3 = vcmask 130048   ;;  %vm210_vm4 = vcmask 97280   ;;  %s362_s29 = sshll.u32 %s466_s16, 3 }
   0xd   : > { %390 = vset.pattern.permute.xlu1 %v402_v2  ;;  %391 = vset.pattern.permute.xlu0 %v402_v2  ;;  %s188_s24 = scalar_lea.vmem %s460_s0, %s361_s19  ;;  %v209_v10 = vld [vmem:[%s461_s1] sm:$0xff]  ;;  %s192_s6 = scalar_lea.vmem %s464_s4, %s362_s29 }
   0xe   : > { %290 = vperm.xlu1 %390, %v287_v1   ;;  %v193_v4 = vld [vmem:[%s188_s24] sm:$0xf] }
   0xf   : > { %200 = vrot.lane.b32.xlu0 %v193_v4, %s403_s25  ;;  %v205_v7 = vrot.slane %v193_v4, 4 }
  0x12   : > { %297 = vperm.xlu1 %390, %v294_v3  }
  0x13   : > { %195 = vrot.lane.b32.xlu0 %v193_v4, %s404_s26 }
  0x81   : > { %v201_v5 = vpop.permute.xlu0 %200 }
  0x82   : > { %v204_v6 = vsel %vm203_vm1, %v201_v5, 0.0 }
  0x83   : > { %371 = vmatpush3.msk.msra.mxu0 %vm207_vm2, %v204_v6 }
  0x84   : > { %372 = vmatprep.subr.mxu0 %v400_v0 }
  0x85   : > { %v196_v8 = vpop.permute.xlu0 %195 }
  0x86   : > { %v199_v9 = vsel %vm198_vm3, 0.0, %v196_v8 }
  0x87   : > { %v208_v11 = vsel %vm207_vm2, %v199_v9, %v205_v7 }
  0x88   : > { %373 = vmatpush3.msra.mxu0 %v208_v11 }
  0x89   : > { %375 = vmatmul.mubr.msk.f32.vlgmr.msra.gmra.mxu0 %vm210_vm4, %v209_v10  ;;  %v291_v12 = vpop.permute.xlu1 %290 }
  0x8d   : > { %v298_v15 = vpop.permute.xlu1 %297 }
 0x149   : > { %v283_v13 = vpop.f32.mrf.mxu0 }
 0x14a   : > { %v293_v14 = vmul.f32 %v291_v12, %v283_v13 }
 0x14b   : > { %v376_v16 = vpop.f32.mrf.mxu0 }
 0x14c   : > { %v300_v17 = vadd.f32 %v298_v15, %v293_v14 }
 0x14e   : > { %v301_v18 = vmax.f32 %v300_v17, 0.0 }
 0x150   : > { %302 = vst [vmem:[%s192_s6] sm:$0xff] %v301_v18 }
 0x151 PF: > { %s14_s15 = sadd.s32 1, %s398_s15  }
 0x152   : > { %p11_p4 = scmp.ge.s32.totalorder %s14_s15, 4  }
 0x154   :  { %13 = sbr.rel (!%p11_p4) target bundleno = 1 (0x1), region = 66 }

// kernel: temporal_transformer.2
= control target key start
LH: loop header
LB: loop body
LE: loop exit
PB: predicated region body
PF: predicated region fallthrough
CT: control target
= control target key end

     0   :  { %s368_s9 = smov 0   ;;  %s392_s0 = inlined_call_operand.vmem [shape: f32[2,4,128], index: 0, kind: input, shape index: {}]   ;;  %s393_s1 = inlined_call_operand.vmem [shape: f32[8,12], index: 1, kind: input, shape index: {}]   ;;  %s394_s2 = inlined_call_operand.vmem [shape: f32[2,2,8], index: 2, kind: output, shape index: {}]  }
   0x1 LB: > { %s308_s10 = sadd.s32 4294967295, %s347_s9   ;;  %p312_p0 = scmp.ge.s32.totalorder %s347_s9, 1  ;;  %s347_s9 = sphi %s368_s9, %s12_s9  }
   0x2   : > { %p111_p1 = scmp.lt.s32.totalorder %s347_s9, 3 }
   0x4   : > { %p112_p2 = pnand %p312_p0, %p111_p1 }
   0x5   : > { %p131_p3 = scmp.lt.s32.totalorder (!%p112_p2), %s308_s10, 1  ;;  %s351_s15 = smov (!%p112_p2), 112  }
   0x6   : > { %115 = sbr.rel (%p112_p2) target bundleno = 475 (0x1db), region = 28  ;;  %s352_s16 = smov (!%p112_p2), 16  }
   0xb   : > { %v349_v0 = vmov 0.0   ;;  %s396_s10 = smov (!%p131_p3, %s308_s10), 1  ;;  %vm350_vm0 = vmmov 0   ;;  %vm149_vm1 = vcmask 916480   ;;  %vm153_vm2 = vcmask 1043456   ;;  %v155_v7 = vld [vmem:[%s393_s1] sm:$0xff] }
   0xc   : > { %322 = vmatprep.subr.mxu0 %v349_v0  ;;  %326 = vmatprep.mubr.msk.f32.mxu0 %vm350_vm0, %v349_v0  ;;  %s313_s11 = sshll.u32 %s396_s10, 2  ;;  %vm144_vm3 = vcmask 130048   ;;  %vm156_vm4 = vcmask 97280   ;;  %v236_v12 = vlaneseq  ;;  %s314_s19 = sshll.u32 %s396_s10, 1  ;;  %vm243_vm5 = vcmask 57344  }
   0xd   : > { %s134_s14 = scalar_lea.vmem %s392_s0, %s313_s11  ;;  %s138_s22 = scalar_lea.vmem %s394_s2, %s314_s19 }
   0xe   : > { %v139_v1 = vld [vmem:[%s134_s14] sm:$0xf]  ;;  %v237_v13 = vand.u32 127, %v236_v12  ;;  %v239_v14 = vshrl.u32 %v236_v12, 7 }
   0xf   : > { %146 = vrot.lane.b32.xlu0 %v139_v1, %s351_s15  ;;  %v151_v4 = vrot.slane %v139_v1, 4 }
  0x10   : > { %v240_v15 = vsub.s32 %v237_v13, %v239_v14 }
  0x13   : > { %141 = vrot.lane.b32.xlu0 %v139_v1, %s352_s16 }
  0x81   : > { %v147_v2 = vpop.permute.xlu0 %146 }
  0x82   : > { %v150_v3 = vsel %vm149_vm1, %v147_v2, 0.0 }
  0x83   : > { %323 = vmatpush3.msk.msra.mxu0 %vm153_vm2, %v150_v3 }
  0x84   : > { %324 = vmatprep.subr.mxu0 %v349_v0 }
  0x85   : > { %v142_v5 = vpop.permute.xlu0 %141 }
  0x86   : > { %v145_v6 = vsel %vm144_vm3, 0.0, %v142_v5 }
  0x87   : > { %v154_v8 = vsel %vm153_vm2, %v145_v6, %v151_v4 }
  0x88   : > { %325 = vmatpush3.msra.mxu0 %v154_v8 }
  0x89   : > { %327 = vmatmul.mubr.msk.f32.vlgmr.msra.gmra.mxu0 %vm156_vm4, %v155_v7 }
 0x149   : > { %v229_v9 = vpop.f32.mrf.mxu0 }
 0x14a   : > { %233 = vadd.xlane.f32.xlu1 %v229_v9  ;;  %v245_v11 = vmul.f32 %v229_v9, %v229_v9 }
 0x14b   : > { %v328_v10 = vpop.f32.mrf.mxu0 }
 0x14e   : > { %246 = vadd.xlane.f32.xlu1 %v245_v11 }
 0x1d3   : > { %v234_v16 = vpop.xlane.xlu1 %233 }
 0x1d4   : > { %v241_v17 = vrot.slane %v234_v16, %v240_v15 }
 0x1d6   : > { %244 = vst.msk [vmem:[%s138_s22] sm:$0x1] %vm243_vm5, %v241_v17 }
 0x1d7   : > { %v247_v18 = vpop.xlane.xlu1 %246 }
 0x1d8   : > { %v252_v19 = vrot.slane %v247_v18, %v240_v15 }
 0x1da   : > { %254 = vst.msk [vmem:[%s138_s22 + $0x1] sm:$0x1] %vm243_vm5, %v252_v19 }
 0x1db PF: > { %s12_s9 = sadd.s32 1, %s347_s9  }
 0x1dc   : > { %p9_p4 = scmp.ge.s32.totalorder %s12_s9, 4  }
 0x1de   :  { %11 = sbr.rel (!%p9_p4) target bundleno = 1 (0x1), region = 58 }

</bundles_post_ra>
